<compile_context>
chip_gen: v7x
topology: tpu7x:2x2x1
jax: 0.10.0
libtpu: 0.0.40
codegen_flags: <defaults>
</compile_context>

<pallas_src>
import functools

import jax
import jax.numpy as jnp
from jax import lax
from jax.experimental import pallas as pl
from jax.experimental.pallas import tpu as pltpu

EPS = 1e-5
LANE = 128


def _bn_train_folded(h, gamma, beta):
    """Training-mode BatchNorm1d (batch stats, biased var) folded to scale/shift."""
    mean = jnp.mean(h, axis=0, keepdims=True)        # (1, Hp)
    d = h - mean                                      # (N, Hp)
    var = jnp.mean(d * d, axis=0, keepdims=True)      # (1, Hp)
    scale = gamma * lax.rsqrt(var + EPS)              # (1, Hp), rsqrt -> EUP
    return d * scale + beta


def residual_block_kernel(x_ref, w1_ref, w2_ref, bn_ref, o_ref, *, matmul_dtype):
    # Weights are pre-transposed to (H_in, H_out): contract RHS dim 0 (plain
    # x @ W), no in-kernel transpose of the weight tile.
    x = x_ref[...]

    # ---- fc1 (bias=False) ----
    h = jnp.dot(x.astype(matmul_dtype), w1_ref[...],
                preferred_element_type=jnp.float32)   # (N, Hp) f32

    # ---- bn1 (f32) + relu; dropout(p=0) == identity ----
    h = _bn_train_folded(h, bn_ref[0:1, :], bn_ref[1:2, :])
    h = jnp.maximum(h, 0.0)

    # ---- fc2 (bias=False) ----
    h = jnp.dot(h.astype(matmul_dtype), w2_ref[...],
                preferred_element_type=jnp.float32)

    # ---- bn2 + relu ----
    h = _bn_train_folded(h, bn_ref[2:3, :], bn_ref[3:4, :])
    h = jnp.maximum(h, 0.0)

    # ---- residual add: re-read x from VMEM (not held live across the matmuls) ----
    o_ref[...] = h + x_ref[...]


def _round_up(n, m):
    return ((n + m - 1) // m) * m


def prepare_params(w1, w2, g1, b1, g2, b2, *, matmul_dtype=jnp.float32):
    """One-time param prep (do this at init, NOT per forward call).

    w1, w2: PyTorch nn.Linear weights, shape (H_out, H_in).
    Returns (w1t, w2t, bn) where w*t are (Hp, Hp) in (H_in, H_out) layout in
    `matmul_dtype`, and bn is a single (4, Hp) f32 array [g1; b1; g2; b2].
    """
    H = w1.shape[0]
    Hp = _round_up(H, LANE)
    pad = Hp - H

    def pad_w(w):
        wt = w.T                                      # (H_in, H_out)
        if pad:
            wt = jnp.pad(wt, ((0, pad), (0, pad)))
        return wt.astype(matmul_dtype)

    def pad_v(v):
        return jnp.pad(v, (0, pad)) if pad else v

    w1t = pad_w(w1)
    w2t = pad_w(w2)
    # Padded gamma/beta = 0 keep padded feature columns identically zero.
    bn = jnp.stack([pad_v(g1), pad_v(b1), pad_v(g2), pad_v(b2)],
                   axis=0).astype(jnp.float32)        # (4, Hp)
    return w1t, w2t, bn


def residual_block(x, w1t, w2t, bn, *,
                   matmul_dtype=jnp.float32,
                   vmem_limit_bytes=32 * 1024 * 1024):
    """x: (N, H) f32; (w1t, w2t, bn) from prepare_params (already padded)."""
    N, H = x.shape
    Hp = w1t.shape[0]
    pad = Hp - H

    xp = jnp.pad(x, ((0, 0), (0, pad))) if pad else x

    vmem = pl.BlockSpec(memory_space=pltpu.VMEM)
    kernel = functools.partial(residual_block_kernel, matmul_dtype=matmul_dtype)

    out = pl.pallas_call(
        kernel,
        out_shape=jax.ShapeDtypeStruct((N, Hp), jnp.float32),
        in_specs=[vmem] * 4,
        out_specs=vmem,
        compiler_params=pltpu.CompilerParams(vmem_limit_bytes=vmem_limit_bytes),
    )(xp, w1t, w2t, bn)

    return out[:, :H] if pad else out


def residual_block_ref(x, w1, w2, g1, b1, g2, b2):
    """Pure-JAX reference mirroring the PyTorch module (training-mode BN)."""
    res = x
    h = x @ w1.T
    m = h.mean(0, keepdims=True)
    v = ((h - m) ** 2).mean(0, keepdims=True)
    h = (h - m) / jnp.sqrt(v + EPS) * g1 + b1
    h = jnp.maximum(h, 0.0)
    h = h @ w2.T
    m = h.mean(0, keepdims=True)
    v = ((h - m) ** 2).mean(0, keepdims=True)
    h = (h - m) / jnp.sqrt(v + EPS) * g2 + b2
    h = jnp.maximum(h, 0.0)
    return h + res


if __name__ == "__main__":
    N, H = 8, 32  # batch, hidden_size

    key = jax.random.PRNGKey(0)
    kx, k1, k2 = jax.random.split(key, 3)

    x = jax.random.normal(kx, (N, H), dtype=jnp.float32)

    # nn.Linear(H, H, bias=False) weights: shape (H_out, H_in)
    bound = 1.0 / jnp.sqrt(H)
    w1 = jax.random.uniform(k1, (H, H), minval=-bound, maxval=bound, dtype=jnp.float32)
    w2 = jax.random.uniform(k2, (H, H), minval=-bound, maxval=bound, dtype=jnp.float32)

    # BatchNorm1d fresh-init affine params
    g1 = jnp.ones((H,), jnp.float32)
    b1 = jnp.zeros((H,), jnp.float32)
    g2 = jnp.ones((H,), jnp.float32)
    b2 = jnp.zeros((H,), jnp.float32)

    ref = residual_block_ref(x, w1, w2, g1, b1, g2, b2)

    # ---- f32 path (default; exactly matches PyTorch f32 semantics) ----
    # Params prepared ONCE (init-time), reused across calls.
    params_f32 = prepare_params(w1, w2, g1, b1, g2, b2, matmul_dtype=jnp.float32)
    params_f32 = jax.tree_util.tree_map(jax.block_until_ready, params_f32)

    out = jax.block_until_ready(residual_block(x, *params_f32))
    assert out.shape == (N, H)
    assert jnp.allclose(out, ref, atol=1e-4, rtol=1e-4), "f32 kernel mismatch vs reference"

    # ---- bf16-weights-in-HBM perf mode (v6e/v7x); BN math stays f32 ----
    params_bf16 = prepare_params(w1, w2, g1, b1, g2, b2, matmul_dtype=jnp.bfloat16)
    out_bf16 = jax.block_until_ready(
        residual_block(x, *params_bf16, matmul_dtype=jnp.bfloat16))
    assert out_bf16.shape == (N, H)
    assert bool(jnp.all(jnp.isfinite(out_bf16)))
    assert jnp.allclose(out_bf16, ref, atol=2e-1, rtol=2e-1), "bf16 kernel far from reference"

    print("KERNEL_OK")
</pallas_src>

<mosaic_0001>
module attributes {stable_mosaic.version = 11 : i64} {
  func.func @residual_block_kernel(%arg0: memref<8x128xf32, #tpu.memory_space<vmem>>, %arg1: memref<128x128xf32, #tpu.memory_space<vmem>>, %arg2: memref<128x128xf32, #tpu.memory_space<vmem>>, %arg3: memref<4x128xf32, #tpu.memory_space<vmem>>, %arg4: memref<8x128xf32, #tpu.memory_space<vmem>>) attributes {dimension_semantics = [], scalar_prefetch = 0 : i64, scratch_operands = 0 : i64, tpu.core_type = #tpu.core_type<tc>} {
    %c0 = arith.constant 0 : index
    %c0_0 = arith.constant 0 : index
    %0 = vector.load %arg0[%c0, %c0_0] : memref<8x128xf32, #tpu.memory_space<vmem>>, vector<8x128xf32>
    %c0_1 = arith.constant 0 : index
    %c0_2 = arith.constant 0 : index
    %1 = vector.load %arg1[%c0_1, %c0_2] : memref<128x128xf32, #tpu.memory_space<vmem>>, vector<128x128xf32>
    %cst = arith.constant dense<0.000000e+00> : vector<8x128xf32>
    %2 = tpu.matmul %0, %1, %cst {dimension_numbers = #tpu.dot_dimension_numbers<[1], [0], [0], [1], [0, 0, 1, 1], [], []>} : vector<8x128xf32>, vector<128x128xf32>, vector<8x128xf32> -> vector<8x128xf32>
    %c0_3 = arith.constant 0 : index
    %c0_4 = arith.constant 0 : index
    %3 = vector.load %arg3[%c0_3, %c0_4] : memref<4x128xf32, #tpu.memory_space<vmem>>, vector<1x128xf32>
    %c1 = arith.constant 1 : index
    %c0_5 = arith.constant 0 : index
    %4 = vector.load %arg3[%c1, %c0_5] : memref<4x128xf32, #tpu.memory_space<vmem>>, vector<1x128xf32>
    %cst_6 = arith.constant dense<0.000000e+00> : vector<128xf32>
    %5 = vector.multi_reduction <add>, %2, %cst_6 [0] : vector<8x128xf32> to vector<128xf32>
    %6 = vector.shape_cast %5 : vector<128xf32> to vector<1x128xf32>
    %cst_7 = arith.constant 8.000000e+00 : f32
    %7 = vector.broadcast %cst_7 : f32 to vector<1x128xf32>
    %8 = arith.divf %6, %7 : vector<1x128xf32>
    %9 = vector.broadcast %8 : vector<1x128xf32> to vector<8x128xf32>
    %10 = arith.subf %2, %9 : vector<8x128xf32>
    %11 = arith.mulf %10, %10 : vector<8x128xf32>
    %cst_8 = arith.constant dense<0.000000e+00> : vector<128xf32>
    %12 = vector.multi_reduction <add>, %11, %cst_8 [0] : vector<8x128xf32> to vector<128xf32>
    %13 = vector.shape_cast %12 : vector<128xf32> to vector<1x128xf32>
    %cst_9 = arith.constant 8.000000e+00 : f32
    %14 = vector.broadcast %cst_9 : f32 to vector<1x128xf32>
    %15 = arith.divf %13, %14 : vector<1x128xf32>
    %cst_10 = arith.constant 9.99999974E-6 : f32
    %16 = vector.broadcast %cst_10 : f32 to vector<1x128xf32>
    %17 = arith.addf %15, %16 : vector<1x128xf32>
    %18 = math.rsqrt %17 : vector<1x128xf32>
    %19 = arith.mulf %3, %18 : vector<1x128xf32>
    %20 = vector.broadcast %19 : vector<1x128xf32> to vector<8x128xf32>
    %21 = arith.mulf %10, %20 : vector<8x128xf32>
    %22 = vector.broadcast %4 : vector<1x128xf32> to vector<8x128xf32>
    %23 = arith.addf %21, %22 : vector<8x128xf32>
    %cst_11 = arith.constant 0.000000e+00 : f32
    %24 = vector.broadcast %cst_11 : f32 to vector<8x128xf32>
    %25 = arith.maximumf %23, %24 : vector<8x128xf32>
    %c0_12 = arith.constant 0 : index
    %c0_13 = arith.constant 0 : index
    %26 = vector.load %arg2[%c0_12, %c0_13] : memref<128x128xf32, #tpu.memory_space<vmem>>, vector<128x128xf32>
    %cst_14 = arith.constant dense<0.000000e+00> : vector<8x128xf32>
    %27 = tpu.matmul %25, %26, %cst_14 {dimension_numbers = #tpu.dot_dimension_numbers<[1], [0], [0], [1], [0, 0, 1, 1], [], []>} : vector<8x128xf32>, vector<128x128xf32>, vector<8x128xf32> -> vector<8x128xf32>
    %c2 = arith.constant 2 : index
    %c0_15 = arith.constant 0 : index
    %28 = vector.load %arg3[%c2, %c0_15] : memref<4x128xf32, #tpu.memory_space<vmem>>, vector<1x128xf32>
    %c3 = arith.constant 3 : index
    %c0_16 = arith.constant 0 : index
    %29 = vector.load %arg3[%c3, %c0_16] : memref<4x128xf32, #tpu.memory_space<vmem>>, vector<1x128xf32>
    %cst_17 = arith.constant dense<0.000000e+00> : vector<128xf32>
    %30 = vector.multi_reduction <add>, %27, %cst_17 [0] : vector<8x128xf32> to vector<128xf32>
    %31 = vector.shape_cast %30 : vector<128xf32> to vector<1x128xf32>
    %cst_18 = arith.constant 8.000000e+00 : f32
    %32 = vector.broadcast %cst_18 : f32 to vector<1x128xf32>
    %33 = arith.divf %31, %32 : vector<1x128xf32>
    %34 = vector.broadcast %33 : vector<1x128xf32> to vector<8x128xf32>
    %35 = arith.subf %27, %34 : vector<8x128xf32>
    %36 = arith.mulf %35, %35 : vector<8x128xf32>
    %cst_19 = arith.constant dense<0.000000e+00> : vector<128xf32>
    %37 = vector.multi_reduction <add>, %36, %cst_19 [0] : vector<8x128xf32> to vector<128xf32>
    %38 = vector.shape_cast %37 : vector<128xf32> to vector<1x128xf32>
    %cst_20 = arith.constant 8.000000e+00 : f32
    %39 = vector.broadcast %cst_20 : f32 to vector<1x128xf32>
    %40 = arith.divf %38, %39 : vector<1x128xf32>
    %cst_21 = arith.constant 9.99999974E-6 : f32
    %41 = vector.broadcast %cst_21 : f32 to vector<1x128xf32>
    %42 = arith.addf %40, %41 : vector<1x128xf32>
    %43 = math.rsqrt %42 : vector<1x128xf32>
    %44 = arith.mulf %28, %43 : vector<1x128xf32>
    %45 = vector.broadcast %44 : vector<1x128xf32> to vector<8x128xf32>
    %46 = arith.mulf %35, %45 : vector<8x128xf32>
    %47 = vector.broadcast %29 : vector<1x128xf32> to vector<8x128xf32>
    %48 = arith.addf %46, %47 : vector<8x128xf32>
    %cst_22 = arith.constant 0.000000e+00 : f32
    %49 = vector.broadcast %cst_22 : f32 to vector<8x128xf32>
    %50 = arith.maximumf %48, %49 : vector<8x128xf32>
    %c0_23 = arith.constant 0 : index
    %c0_24 = arith.constant 0 : index
    %51 = vector.load %arg0[%c0_23, %c0_24] : memref<8x128xf32, #tpu.memory_space<vmem>>, vector<8x128xf32>
    %52 = arith.addf %50, %51 : vector<8x128xf32>
    %c0_25 = arith.constant 0 : index
    %c0_26 = arith.constant 0 : index
    %53 = vector.load %arg4[%c0_25, %c0_26] : memref<8x128xf32, #tpu.memory_space<vmem>>, vector<8x128xf32>
    tpu.vector_store %arg4[%c0_25, %c0_26], %52 {strides = array<i32>} : memref<8x128xf32, #tpu.memory_space<vmem>>, vector<8x128xf32>,
    return
  }
}

</mosaic_0001>

<bundles_post_ra>
// kernel: tpu_custom_call.1
= control target key start
LH: loop header
LB: loop body
LE: loop exit
PB: predicated region body
PF: predicated region fallthrough
CT: control target
= control target key end

     0   :  { %9 = vsyncpa [#allocation3], 0  ;;  %s694_s0 = inlined_call_operand.hbm [shape: f32[8,128], index: 0, kind: input, shape index: {}]   ;;  %s695_s1 = inlined_call_operand.hbm [shape: f32[128,128], index: 1, kind: input, shape index: {}]   ;;  %s696_s2 = inlined_call_operand.hbm [shape: f32[128,128], index: 2, kind: input, shape index: {}]   ;;  %s697_s3 = inlined_call_operand.vmem [shape: f32[4,128], index: 3, kind: input, shape index: {}]   ;;  %s698_s4 = inlined_call_operand.hbm [shape: f32[8,128], index: 4, kind: output, shape index: {}]  }
   0x1   :  { %10 = vsyncpa [#allocation6], 0 }
   0x2   :  { %11 = vsyncpa [#allocation4], 0  ;;  %s574_s15 = smov [#allocation5]   ;;  %s480_s19 = scalar_lea.hbm %s695_s1, 2048 }
   0x3   :  { %s27_s16 = sshll.u32 %s574_s15, 4  ;;  %p481_p0 = scmp.ne.s32.totalorder %s695_s1, %s480_s19  ;;  %s28_s16 = int_to_ptr.vmem [resolvable:$true] %s27_s16 }
   0x4   :  { %p484_p1 = scmp.lt.u32.totalorder %s480_s19, %s695_s1 }
   0x6   :  { %p486_p2 = pnand %p484_p1, %p481_p0 }
   0x8   :  { %489 = shalt.err (!%p486_p2)
}
   0x9   :  { %s490_s24 = scalar_lea.vmem %s28_s16, 2048  ;;  %p495_p4 = scmp.lt.s32.totalorder %s28_s16, %s28_s16 }
   0xa   :  { %p491_p3 = scmp.ne.s32.totalorder %s28_s16, %s490_s24  ;;  %p496_p5 = scmp.lt.s32.totalorder %s490_s24, %s490_s24 }
   0xc   :  { %p497_p6 = por %p496_p5, %p495_p4 }
   0xe   :  { %p498_p7 = pnand %p497_p6, %p491_p3 }
  0x10   :  { %501 = shalt.err (!%p498_p7)
}
  0x11   :  { %s575_s25 = smov 128   ;;  %s576_s26 = smov 8  }
  0x12   :  { %33 = dma.hbm_to_vmem [thread:$0]  %s695_s1, 2048, %s28_s16, [#allocation6], %s575_s25, %s575_s25, %s576_s26  }
  0x13   :  { %s577_s29 = smov [#allocation2]   ;;  %s578_s5 = smov [#allocation7]  }
  0x14   :  { %s18_s30 = sshll.u32 %s577_s29, 4  ;;  %s39_s6 = sshll.u32 %s578_s5, 4  ;;  %s19_s30 = int_to_ptr.vmem [resolvable:$true] %s18_s30  ;;  %s40_s6 = int_to_ptr.vmem [resolvable:$true] %s39_s6 }
  0x15   :  { %s502_s9 = scalar_lea.hbm %s694_s0, 128 }
  0x16   :  { %p503_p8 = scmp.ne.s32.totalorder %s694_s0, %s502_s9  ;;  %p506_p9 = scmp.lt.u32.totalorder %s502_s9, %s694_s0 }
  0x18   :  { %p508_p10 = pnand %p506_p9, %p503_p8 }
  0x1a   :  { %511 = shalt.err (!%p508_p10)
}
  0x1b   :  { %s512_s1 = scalar_lea.vmem %s19_s30, 128  ;;  %p517_p12 = scmp.lt.s32.totalorder %s19_s30, %s19_s30 }
  0x1c   :  { %p513_p11 = scmp.ne.s32.totalorder %s19_s30, %s512_s1  ;;  %p518_p13 = scmp.lt.s32.totalorder %s512_s1, %s512_s1 }
  0x1e   :  { %p519_p0 = por %p518_p13, %p517_p12 }
  0x20   :  { %p520_p1 = pnand %p519_p0, %p513_p11 }
  0x22   :  { %523 = shalt.err (!%p520_p1)
}
  0x23   :  { %21 = dma.hbm_to_vmem [thread:$0]  %s694_s0, 128, %s19_s30, [#allocation3]  }
  0x24   :  { %s524_s18 = scalar_lea.hbm %s696_s2, 2048 }
  0x25   :  { %p525_p2 = scmp.ne.s32.totalorder %s696_s2, %s524_s18  ;;  %p528_p3 = scmp.lt.u32.totalorder %s524_s18, %s696_s2 }
  0x27   :  { %p530_p4 = pnand %p528_p3, %p525_p2 }
  0x29   :  { %533 = shalt.err (!%p530_p4)
}
  0x2a   :  { %s534_s23 = scalar_lea.vmem %s40_s6, 2048  ;;  %p539_p6 = scmp.lt.s32.totalorder %s40_s6, %s40_s6 }
  0x2b   :  { %p535_p5 = scmp.ne.s32.totalorder %s40_s6, %s534_s23  ;;  %p540_p7 = scmp.lt.s32.totalorder %s534_s23, %s534_s23 }
  0x2d   :  { %p541_p8 = por %p540_p7, %p539_p6 }
  0x2f   :  { %p542_p9 = pnand %p541_p8, %p535_p5 }
  0x31   :  { %545 = shalt.err (!%p542_p9)
}
  0x32   :  { %45 = dma.hbm_to_vmem [thread:$0]  %s696_s2, 2048, %s40_s6, [#allocation6], %s575_s25, %s575_s25, %s576_s26  }
  0x33   :  { %568 = dma.done.wait [#allocation3], 128  }
  0x34   :  { %569 = vsyncadd [#allocation3], 4294967168 }
  0x35   :  { %570 = dma.done.wait [#allocation6], 4096  }
  0x36   :  { %571 = vsyncadd [#allocation6], 4294963200  ;;  %v579_v0 = vmov 0.0|0.0   ;;  %vm580_vm0 = vmmov 0   ;;  %v581_v1 = vmov 0.0   ;;  %v58_v2 = vld [vmem:[#allocation5] sm:$0xff] }
  0x37   :  { %419 = vmatprep.subr.bf16.mxu0 %v579_v0  ;;  %381 = vmatprep.mubr.msk.f32.mxu0 %vm580_vm0, %v581_v1  ;;  %v59_v3 = vld [vmem:[#allocation5 + $0x8] sm:$0xff]  ;;  %v60_v4 = vld [vmem:[#allocation5 + $0x10] sm:$0xff]  ;;  %v61_v6 = vld [vmem:[#allocation5 + $0x18] sm:$0xff]  ;;  %s582_s6 = smov [#allocation8]  }
  0x38   :  { %443 = vmatprep.subr.bf16.mxu1 %v579_v0  ;;  %416 = vmatprep.mubr.msk.f32.mxu1 %vm580_vm0, %v581_v1  ;;  %v420_v5 = vpack.c.bf16 %v59_v3, %v58_v2  ;;  %v423_v7 = vpack.c.bf16 %v61_v6, %v60_v4  ;;  %v62_v8 = vld [vmem:[#allocation5 + $0x20] sm:$0xff]  ;;  %v63_v9 = vld [vmem:[#allocation5 + $0x28] sm:$0xff]  ;;  %v64_v11 = vld [vmem:[#allocation5 + $0x30] sm:$0xff]  ;;  %v166_v6 = vlaneseq  ;;  %s303_s7 = sshll.u32 %s582_s6, 4  ;;  %s304_s7 = int_to_ptr.vmem [resolvable:$true] %s303_s7 }
  0x39   :  { %v426_v10 = vpack.c.bf16 %v63_v9, %v62_v8  ;;  %v65_v12 = vld [vmem:[#allocation5 + $0x38] sm:$0xff]  ;;  %v66_v14 = vld [vmem:[#allocation5 + $0x40] sm:$0xff]  ;;  %v67_v15 = vld [vmem:[#allocation5 + $0x48] sm:$0xff]  ;;  %s546_s8 = scalar_lea.vmem %s304_s7, 128  ;;  %p551_p11 = scmp.lt.s32.totalorder %s304_s7, %s304_s7 }
  0x3a   :  { %421 = vmatpush3.bf16.msra.mxu0 %v420_v5  ;;  %v429_v13 = vpack.c.bf16 %v65_v12, %v64_v11  ;;  %v432_v16 = vpack.c.bf16 %v67_v15, %v66_v14  ;;  %v68_v17 = vld [vmem:[#allocation5 + $0x50] sm:$0xff]  ;;  %v69_v18 = vld [vmem:[#allocation5 + $0x58] sm:$0xff]  ;;  %v70_v20 = vld [vmem:[#allocation5 + $0x60] sm:$0xff]  ;;  %p547_p10 = scmp.ne.s32.totalorder %s304_s7, %s546_s8  ;;  %p552_p12 = scmp.lt.s32.totalorder %s546_s8, %s546_s8 }
  0x3b   :  { %422 = vmatprep.subr.bf16.mxu0 %v579_v0  ;;  %v435_v19 = vpack.c.bf16 %v69_v18, %v68_v17  ;;  %v71_v21 = vld [vmem:[#allocation5 + $0x68] sm:$0xff]  ;;  %v72_v23 = vld [vmem:[#allocation5 + $0x70] sm:$0xff]  ;;  %v73_v24 = vld [vmem:[#allocation5 + $0x78] sm:$0xff] }
  0x3c   :  { %v438_v22 = vpack.c.bf16 %v71_v21, %v70_v20  ;;  %v441_v25 = vpack.c.bf16 %v73_v24, %v72_v23  ;;  %v659_v26 = vld [vmem:[#allocation2] sm:$0xff]  ;;  %v177_v27 = vld [vmem:[#allocation7] sm:$0xff]  ;;  %v178_v28 = vld [vmem:[#allocation7 + $0x8] sm:$0xff]  ;;  %p553_p13 = por %p552_p12, %p551_p11 }
  0x3d   :  { %v444_v29 = vpack.c.bf16 %v178_v28, %v177_v27  ;;  %v179_v30 = vld [vmem:[#allocation7 + $0x10] sm:$0xff]  ;;  %v180_v31 = vld [vmem:[#allocation7 + $0x18] sm:$0xff]  ;;  %v181_v33 = vld [vmem:[#allocation7 + $0x20] sm:$0xff] }
  0x3e   :  { %424 = vmatpush3.bf16.msra.mxu0 %v423_v7  ;;  %v447_v32 = vpack.c.bf16 %v180_v31, %v179_v30  ;;  %v182_v34 = vld [vmem:[#allocation7 + $0x28] sm:$0xff]  ;;  %v183_v36 = vld [vmem:[#allocation7 + $0x30] sm:$0xff]  ;;  %v184_v37 = vld [vmem:[#allocation7 + $0x38] sm:$0xff]  ;;  %v167_v7 = vshrl.u32 %v166_v6, 7  ;;  %p554_p0 = pnand %p553_p13, %p547_p10 }
  0x3f   :  { %425 = vmatprep.subr.bf16.mxu0 %v579_v0  ;;  %445 = vmatpush3.bf16.msra.mxu1 %v444_v29  ;;  %v450_v35 = vpack.c.bf16 %v182_v34, %v181_v33  ;;  %v453_v38 = vpack.c.bf16 %v184_v37, %v183_v36  ;;  %v185_v39 = vld [vmem:[#allocation7 + $0x40] sm:$0xff]  ;;  %v186_v40 = vld [vmem:[#allocation7 + $0x48] sm:$0xff]  ;;  %v187_v42 = vld [vmem:[#allocation7 + $0x50] sm:$0xff] }
  0x40   :  { %446 = vmatprep.subr.bf16.mxu1 %v579_v0  ;;  %v456_v41 = vpack.c.bf16 %v186_v40, %v185_v39  ;;  %v188_v43 = vld [vmem:[#allocation7 + $0x58] sm:$0xff]  ;;  %v189_v45 = vld [vmem:[#allocation7 + $0x60] sm:$0xff]  ;;  %v190_v46 = vld [vmem:[#allocation7 + $0x68] sm:$0xff]  ;;  %v168_v9 = vsub.s32 0, %v167_v7 }
  0x41   :  { %v459_v44 = vpack.c.bf16 %v188_v43, %v187_v42  ;;  %v462_v47 = vpack.c.bf16 %v190_v46, %v189_v45  ;;  %v191_v48 = vld [vmem:[#allocation7 + $0x70] sm:$0xff]  ;;  %v192_v49 = vld [vmem:[#allocation7 + $0x78] sm:$0xff] }
  0x42   :  { %427 = vmatpush3.bf16.msra.mxu0 %v426_v10  ;;  %v465_v50 = vpack.c.bf16 %v192_v49, %v191_v48  ;;  %v144_v8 = vld [vmem:[%s697_s3] sm:$0x1]  ;;  %v263_v37 = vld [vmem:[%s697_s3 + $0x2] sm:$0x1] }
  0x43   :  { %428 = vmatprep.subr.bf16.mxu0 %v579_v0  ;;  %448 = vmatpush3.bf16.msra.mxu1 %v447_v32 }
  0x44   :  { %449 = vmatprep.subr.bf16.mxu1 %v579_v0 }
  0x46   :  { %430 = vmatpush3.bf16.msra.mxu0 %v429_v13  ;;  %v313_v13 = vld [vmem:[%s697_s3 + $0x1] ss:$0 sm:$0xff] }
  0x47   :  { %431 = vmatprep.subr.bf16.mxu0 %v579_v0  ;;  %451 = vmatpush3.bf16.msra.mxu1 %v450_v35 }
  0x48   :  { %452 = vmatprep.subr.bf16.mxu1 %v579_v0 }
  0x4a   :  { %433 = vmatpush3.bf16.msra.mxu0 %v432_v16 }
  0x4b   :  { %434 = vmatprep.subr.bf16.mxu0 %v579_v0  ;;  %454 = vmatpush3.bf16.msra.mxu1 %v453_v38 }
  0x4c   :  { %455 = vmatprep.subr.bf16.mxu1 %v579_v0 }
  0x4e   :  { %436 = vmatpush3.bf16.msra.mxu0 %v435_v19 }
  0x4f   :  { %437 = vmatprep.subr.bf16.mxu0 %v579_v0  ;;  %457 = vmatpush3.bf16.msra.mxu1 %v456_v41  ;;  %v314_v41 = vld [vmem:[%s697_s3 + $0x3] ss:$0 sm:$0xff] }
  0x50   :  { %458 = vmatprep.subr.bf16.mxu1 %v579_v0 }
  0x52   :  { %439 = vmatpush3.bf16.msra.mxu0 %v438_v22 }
  0x53   :  { %440 = vmatprep.subr.bf16.mxu0 %v579_v0  ;;  %460 = vmatpush3.bf16.msra.mxu1 %v459_v44 }
  0x54   :  { %461 = vmatprep.subr.bf16.mxu1 %v579_v0 }
  0x56   :  { %442 = vmatpush3.bf16.msra.mxu0 %v441_v25 }
  0x57   :  { %463 = vmatpush3.bf16.msra.mxu1 %v462_v47 }
  0x58   :  { %464 = vmatprep.subr.bf16.mxu1 %v579_v0 }
  0x59   :  { %382 = vmatmul.mubr.f32.vlgmr.msra.gmra.mrb[0].mxu0 %v659_v26 }
  0x5b   :  { %466 = vmatpush3.bf16.msra.mxu1 %v465_v50 }
 0x12c   :  { %v140_v51 = vpop.f32.mrb[0].mxu0 }
 0x12d   :  { %v146_v52 = vrot.slane %v140_v51, 4  ;;  %v383_v53 = vpop.f32.mrb[1].mxu0 }
 0x12f   :  { %v147_v54 = vadd.f32 %v146_v52, %v140_v51 }
 0x131   :  { %v148_v55 = vrot.slane %v147_v54, 2 }
 0x133   :  { %v149_v56 = vadd.f32 %v148_v55, %v147_v54 }
 0x135   :  { %v150_v57 = vrot.slane %v149_v56, 1 }
 0x137   :  { %v151_v58 = vadd.f32 %v150_v57, %v149_v56 }
 0x139   :  { %v153_v59 = vmul.f32 0.125, %v151_v58 }
 0x13b   :  { %v154_v60 = vsub.f32 %v140_v51, %v153_v59 }
 0x13d   :  { %v155_v61 = vmul.f32 %v154_v60, %v154_v60 }
 0x13f   :  { %v156_v62 = vrot.slane %v155_v61, 4 }
 0x141   :  { %v157_v63 = vadd.f32 %v156_v62, %v155_v61 }
 0x143   :  { %v158_v1 = vrot.slane %v157_v63, 2 }
 0x145   :  { %v159_v2 = vadd.f32 %v158_v1, %v157_v63 }
 0x147   :  { %v160_v0 = vrot.slane %v159_v2, 1 }
 0x149   :  { %v161_v3 = vadd.f32 %v160_v0, %v159_v2 }
 0x14b   :  { %v162_v4 = vmul.f32 0.125, %v161_v3 }
 0x14d   :  { %v163_v5 = vadd.f32 1e-05, %v162_v4 }
 0x14f   :  { %476 = vrsqrt.f32 %v163_v5 }
 0x159   :  { %v477_v10 = vpop.eup %476 }
 0x15a   :  { %v165_v11 = vmul.f32 %v477_v10, %v144_v8 }
 0x15c   :  { %v169_v12 = vrot.slane %v165_v11, %v168_v9 }
 0x15e   :  { %v170_v14 = vmul.f32 %v169_v12, %v154_v60 }
 0x160   :  { %v175_v15 = vadd.f32 %v313_v13, %v170_v14 }
 0x162   :  { %v176_v16 = vmax.f32 %v175_v15, 0.0 }
 0x164   :  { %417 = vmatmul.mubr.f32.vlgmr.msra.gmra.mrb[0].mxu1 %v176_v16 }
 0x237   :  { %v259_v17 = vpop.f32.mrb[0].mxu1 }
 0x238   :  { %v265_v18 = vrot.slane %v259_v17, 4  ;;  %v418_v19 = vpop.f32.mrb[1].mxu1 }
 0x23a   :  { %v266_v20 = vadd.f32 %v265_v18, %v259_v17 }
 0x23c   :  { %v267_v21 = vrot.slane %v266_v20, 2 }
 0x23e   :  { %v268_v22 = vadd.f32 %v267_v21, %v266_v20 }
 0x240   :  { %v269_v23 = vrot.slane %v268_v22, 1 }
 0x242   :  { %v270_v24 = vadd.f32 %v269_v23, %v268_v22 }
 0x244   :  { %v271_v25 = vmul.f32 0.125, %v270_v24 }
 0x246   :  { %v272_v27 = vsub.f32 %v259_v17, %v271_v25 }
 0x248   :  { %v273_v28 = vmul.f32 %v272_v27, %v272_v27 }
 0x24a   :  { %v274_v29 = vrot.slane %v273_v28, 4 }
 0x24c   :  { %v275_v30 = vadd.f32 %v274_v29, %v273_v28 }
 0x24e   :  { %v276_v31 = vrot.slane %v275_v30, 2 }
 0x250   :  { %v277_v32 = vadd.f32 %v276_v31, %v275_v30 }
 0x252   :  { %v278_v33 = vrot.slane %v277_v32, 1 }
 0x254   :  { %v279_v34 = vadd.f32 %v278_v33, %v277_v32 }
 0x256   :  { %v280_v35 = vmul.f32 0.125, %v279_v34 }
 0x258   :  { %v281_v36 = vadd.f32 1e-05, %v280_v35 }
 0x25a   :  { %478 = vrsqrt.f32 %v281_v36 }
 0x264   :  { %v479_v38 = vpop.eup %478 }
 0x265   :  { %v283_v39 = vmul.f32 %v479_v38, %v263_v37 }
 0x267   :  { %v287_v40 = vrot.slane %v283_v39, %v168_v9 }
 0x269   :  { %v288_v42 = vmul.f32 %v287_v40, %v272_v27 }
 0x26b   :  { %v293_v43 = vadd.f32 %v314_v41, %v288_v42 }
 0x26d   :  { %v294_v44 = vmax.f32 %v293_v43, 0.0 }
 0x26f   :  { %v295_v45 = vadd.f32 %v294_v44, %v659_v26 }
 0x271   :  { %296 = vst [vmem:[#allocation8] sm:$0xff] %v295_v45 }
 0x272   :  { %557 = shalt.err (!%p554_p0)
}
 0x273   :  { %s558_s3 = scalar_lea.hbm %s698_s4, 128 }
 0x274   :  { %p559_p1 = scmp.ne.s32.totalorder %s698_s4, %s558_s3  ;;  %p562_p2 = scmp.lt.u32.totalorder %s558_s3, %s698_s4 }
 0x276   :  { %p564_p3 = pnand %p562_p2, %p559_p1 }
 0x278   :  { %567 = shalt.err (!%p564_p3)
}
 0x279   :  { %306 = dma.vmem_to_hbm [thread:$0]  %s304_s7, 128, %s698_s4, [#allocation4]  }
 0x27a   :  { %572 = dma.done.wait [#allocation4], 128  }
 0x27b   :  { %573 = vsyncadd [#allocation4], 4294967168 }
 0x27c   :  { %310 = vsyncpa [#allocation3], 1 }
 0x27d   :  { %311 = vsyncpa [#allocation6], 1 }
 0x27e   :  { %312 = vsyncpa [#allocation4], 1 }

</bundles_post_ra>
